<compile_context>
chip_gen: v7x
topology: tpu7x:2x2x1
jax: 0.10.0
libtpu: 0.0.40
codegen_flags: <defaults>
</compile_context>

<pallas_src>
import functools

import jax
import jax.numpy as jnp
from jax import lax
from jax.experimental import pallas as pl
from jax.experimental.pallas import tpu as pltpu


def _round_up(a: int, b: int) -> int:
    return (a + b - 1) // b * b


# ----------------------------------------------------------------------------
# pltpu.roll sign-convention probe (computed once, eagerly, outside any jit).
# The kernel needs tap[i] = x[i + off]; with jnp.roll semantics that is
# shift = width - off, with the opposite convention it is shift = off.
# A tiny probe kernel makes the main kernel correct under either convention.
# ----------------------------------------------------------------------------
_ROLL_IS_JNP_CONVENTION = None


def _roll_is_jnp_convention() -> bool:
    global _ROLL_IS_JNP_CONVENTION
    if _ROLL_IS_JNP_CONVENTION is None:
        def probe(x_ref, o_ref):
            o_ref[...] = pltpu.roll(x_ref[...], shift=1, axis=1)

        x = jnp.broadcast_to(jnp.arange(128, dtype=jnp.float32), (8, 128))
        out = pl.pallas_call(
            probe, out_shape=jax.ShapeDtypeStruct((8, 128), jnp.float32))(x)
        # jnp.roll convention: result[:, 1] == x[:, 0] == 0.
        _ROLL_IS_JNP_CONVENTION = bool(out[0, 1] == 0.0)
    return _ROLL_IS_JNP_CONVENTION


# ----------------------------------------------------------------------------
# Kernel
# ----------------------------------------------------------------------------
def convblock_kernel(x_ref, w_ref, b_ref, o_ref, *, row_stride, roll_is_jnp):
    # x_ref: (Cin, Mp_pad)     reflection-padded image, spatial on lanes (bf16)
    # w_ref: (9, Cout_T, Cin)  per-tap weights (bf16), tap index t = ky*3 + kx
    # b_ref: (Cout_T, 1)       bias (f32)
    # o_ref: (Cout_T, Mp_pad)  lane-dense output tile
    x = x_ref[...]
    width = x.shape[-1]
    acc = None
    for ky in range(3):
        for kx in range(3):
            off = ky * row_stride + kx            # static lane offset of tap
            if off == 0:
                tap = x
            else:
                shift = (width - off) % width if roll_is_jnp else off
                tap = pltpu.roll(x, shift=shift, axis=1)   # tap[i] = x[i + off]
            part = jnp.dot(w_ref[ky * 3 + kx], tap,
                           preferred_element_type=jnp.float32)
            acc = part if acc is None else acc + part
    acc = acc + b_ref[...]                         # (Cout_T, 1) broadcasts over lanes
    # ELU (alpha=1): expm1 for accuracy; clamp so exp never sees big positives.
    acc = jnp.where(acc > 0, acc, jnp.expm1(jnp.minimum(acc, 0.0)))
    o_ref[...] = acc.astype(o_ref.dtype)


# ----------------------------------------------------------------------------
# Wrapper
# ----------------------------------------------------------------------------
def conv_block(x_nchw, w_hwio, bias, *, compute_dtype=jnp.bfloat16,
               out_dtype=None, vmem_budget_bytes=40 * 1024 * 1024):
    """ConvBlock forward. x_nchw: (N, Cin, H, W) -> (N, Cout, H, W)."""
    N, Cin, H, W = x_nchw.shape
    kh, kw, wcin, Cout = w_hwio.shape
    assert (kh, kw, wcin) == (3, 3, Cin), "expected (3,3,Cin,Cout) HWIO weight"
    out_dtype = x_nchw.dtype if out_dtype is None else out_dtype

    Hp, Wp = H + 2, W + 2
    Mp = Hp * Wp
    Mp_pad = _round_up(Mp, 128)                    # lane-dense spatial axis

    # Reflection pad (== nn.ReflectionPad2d(1)), cast to MXU dtype, flatten
    # spatial, zero-pad the flat axis to a multiple of 128.  The junk tail is
    # never read by any valid output position.
    xpad = jnp.pad(x_nchw, ((0, 0), (0, 0), (1, 1), (1, 1)), mode="reflect")
    xflat = xpad.astype(compute_dtype).reshape(N, Cin, Mp)
    if Mp_pad != Mp:
        xflat = jnp.pad(xflat, ((0, 0), (0, 0), (0, Mp_pad - Mp)))

    # (3,3,Cin,Cout) -> (9, Cout, Cin), tap-major (t = ky*3 + kx); bias f32.
    w9 = jnp.transpose(w_hwio.reshape(9, Cin, Cout), (0, 2, 1)).astype(compute_dtype)
    b2 = bias.reshape(Cout, 1).astype(jnp.float32)

    # --- VMEM-budget-driven Cout tile ---------------------------------------
    isz_in = jnp.dtype(compute_dtype).itemsize
    isz_out = jnp.dtype(out_dtype).itemsize
    fixed = 2 * Cin * Mp_pad * isz_in              # double-buffered input block
    fixed += 2 * Cin * Mp_pad * isz_in             # tap temporaries (slack)
    per_cout = Mp_pad * (2 * isz_out + 4) + 9 * Cin * isz_in + 4
    cands = [c for c in range(Cout, 0, -1)
             if Cout % c == 0 and (c % 8 == 0 or c == Cout)]
    fitting = [c for c in cands
               if fixed + c * per_cout <= vmem_budget_bytes] or [cands[-1]]
    cout_t = fitting[0]
    if N == 1:                                     # >= 2 steps for v7x megacore
        multi = [c for c in fitting if Cout // c >= 2]
        if multi:
            cout_t = multi[0]
    n_co = Cout // cout_t

    est = fixed + cout_t * per_cout + 9 * Cout * Cin * isz_in + Cout * 4
    # Cap at 64 MiB so the same setting is safe on v7x's 64 MiB physical VMEM.
    vmem_limit = int(max(32 << 20, min(64 << 20, 2 * est)))

    grid = (N, n_co)
    kernel = functools.partial(convblock_kernel, row_stride=Wp,
                               roll_is_jnp=_roll_is_jnp_convention())

    out = pl.pallas_call(
        kernel,
        out_shape=jax.ShapeDtypeStruct((N, Cout, Mp_pad), out_dtype),
        grid_spec=pltpu.PrefetchScalarGridSpec(
            num_scalar_prefetch=0,
            grid=grid,
            in_specs=[
                pl.BlockSpec((None, Cin, Mp_pad), lambda n, co: (n, 0, 0)),
                pl.BlockSpec((9, cout_t, Cin), lambda n, co: (0, co, 0)),
                pl.BlockSpec((cout_t, 1), lambda n, co: (co, 0)),
            ],
            out_specs=pl.BlockSpec((None, cout_t, Mp_pad),
                                   lambda n, co: (n, co, 0)),
        ),
        compiler_params=pltpu.CompilerParams(
            dimension_semantics=("parallel", "parallel"),
            vmem_limit_bytes=vmem_limit,
        ),
    )(xflat, w9, b2)

    # Flattened output rows have stride Wp: keep first H rows / first W cols.
    out = out[:, :, : H * Wp].reshape(N, Cout, H, Wp)[:, :, :, :W]
    return out


# ----------------------------------------------------------------------------
# Pure-JAX f32 reference (for the correctness check)
# ----------------------------------------------------------------------------
def conv_block_reference(x_nchw, w_hwio, bias):
    x_nhwc = jnp.transpose(x_nchw, (0, 2, 3, 1))
    xpad = jnp.pad(x_nhwc, ((0, 0), (1, 1), (1, 1), (0, 0)), mode="reflect")
    y = lax.conv_general_dilated(
        xpad, w_hwio, window_strides=(1, 1), padding="VALID",
        dimension_numbers=("NHWC", "HWIO", "NHWC"),
    )
    y = y + bias[None, None, None, :]
    y = jnp.where(y > 0, y, jnp.expm1(y))
    return jnp.transpose(y, (0, 3, 1, 2))


if __name__ == "__main__":
    # Small shapes consistent with ConvBlock(in_channels=4, out_channels=8).
    N, Cin, H, W = 2, 4, 16, 16
    Cout = 8

    key = jax.random.PRNGKey(0)
    k_x, k_w, k_b = jax.random.split(key, 3)

    x = jax.random.normal(k_x, (N, Cin, H, W), dtype=jnp.float32)
    w = 0.1 * jax.random.normal(k_w, (3, 3, Cin, Cout), dtype=jnp.float32)  # HWIO
    b = 0.1 * jax.random.normal(k_b, (Cout,), dtype=jnp.float32)

    out = jax.block_until_ready(conv_block(x, w, b))
    ref = conv_block_reference(x, w, b)

    assert out.shape == (N, Cout, H, W)
    # bf16 MXU operands with f32 accumulation -> bf16-level tolerance.
    assert jnp.allclose(out, ref, atol=2e-2, rtol=2e-2), "mismatch vs reference"

    print("KERNEL_OK")
</pallas_src>

<mosaic_0001>
module attributes {stable_mosaic.version = 11 : i64} {
  func.func @probe(%arg0: memref<8x128xf32, #tpu.memory_space<vmem>>, %arg1: memref<8x128xf32, #tpu.memory_space<vmem>>) attributes {dimension_semantics = [], scalar_prefetch = 0 : i64, scratch_operands = 0 : i64, tpu.core_type = #tpu.core_type<tc>} {
    %c0 = arith.constant 0 : index
    %c0_0 = arith.constant 0 : index
    %0 = vector.load %arg0[%c0, %c0_0] : memref<8x128xf32, #tpu.memory_space<vmem>>, vector<8x128xf32>
    %c1_i32 = arith.constant 1 : i32
    %1 = tpu.dynamic_rotate %0 by %c1_i32 dim 1 : vector<8x128xf32>, i32 -> vector<8x128xf32>
    %c0_1 = arith.constant 0 : index
    %c0_2 = arith.constant 0 : index
    %2 = vector.load %arg1[%c0_1, %c0_2] : memref<8x128xf32, #tpu.memory_space<vmem>>, vector<8x128xf32>
    tpu.vector_store %arg1[%c0_1, %c0_2], %1 {strides = array<i32>} : memref<8x128xf32, #tpu.memory_space<vmem>>, vector<8x128xf32>,
    return
  }
}

</mosaic_0001>

<bundles_post_ra>
// kernel: tpu_custom_call.1
= control target key start
LH: loop header
LB: loop body
LE: loop exit
PB: predicated region body
PF: predicated region fallthrough
CT: control target
= control target key end

     0   :  { %6 = vsyncpa [#allocation3], 0  ;;  %s128_s0 = inlined_call_operand.hbm [shape: f32[8,128], index: 0, kind: input, shape index: {}]   ;;  %s129_s1 = inlined_call_operand.hbm [shape: f32[8,128], index: 1, kind: output, shape index: {}]  }
   0x1   :  { %7 = vsyncpa [#allocation4], 0  ;;  %s91_s6 = smov [#allocation2]   ;;  %s43_s10 = scalar_lea.hbm %s128_s0, 128 }
   0x2   :  { %s14_s7 = sshll.u32 %s91_s6, 4  ;;  %p44_p0 = scmp.ne.s32.totalorder %s128_s0, %s43_s10  ;;  %s15_s7 = int_to_ptr.vmem [resolvable:$true] %s14_s7 }
   0x3   :  { %p47_p1 = scmp.lt.u32.totalorder %s43_s10, %s128_s0 }
   0x5   :  { %p49_p2 = pnand %p47_p1, %p44_p0 }
   0x7   :  { %52 = shalt.err (!%p49_p2)
}
   0x8   :  { %s53_s15 = scalar_lea.vmem %s15_s7, 128  ;;  %p58_p4 = scmp.lt.s32.totalorder %s15_s7, %s15_s7 }
   0x9   :  { %p54_p3 = scmp.ne.s32.totalorder %s15_s7, %s53_s15  ;;  %p59_p5 = scmp.lt.s32.totalorder %s53_s15, %s53_s15 }
   0xb   :  { %p60_p6 = por %p59_p5, %p58_p4 }
   0xd   :  { %p61_p7 = pnand %p60_p6, %p54_p3 }
   0xf   :  { %64 = shalt.err (!%p61_p7)
}
  0x10   :  { %17 = dma.hbm_to_vmem [thread:$0]  %s128_s0, 128, %s15_s7, [#allocation3]  }
  0x11   :  { %87 = dma.done.wait [#allocation3], 128  }
  0x12   :  { %88 = vsyncadd [#allocation3], 4294967168  ;;  %v21_v0 = vld [vmem:[#allocation2] sm:$0xff]  ;;  %s92_s18 = smov 1   ;;  %s93_s19 = smov [#allocation5]  }
  0x13   :  { %22 = vrot.lane.b32.xlu0 %v21_v0, %s92_s18  ;;  %s31_s20 = sshll.u32 %s93_s19, 4  ;;  %s32_s20 = int_to_ptr.vmem [resolvable:$true] %s31_s20 }
  0x14   :  { %s65_s21 = scalar_lea.vmem %s32_s20, 128  ;;  %p70_p9 = scmp.lt.s32.totalorder %s32_s20, %s32_s20 }
  0x15   :  { %p66_p8 = scmp.ne.s32.totalorder %s32_s20, %s65_s21  ;;  %p71_p10 = scmp.lt.s32.totalorder %s65_s21, %s65_s21 }
  0x17   :  { %p72_p11 = por %p71_p10, %p70_p9 }
  0x19   :  { %p73_p12 = pnand %p72_p11, %p66_p8 }
  0x85   :  { %v23_v1 = vpop.permute.xlu0 %22 }
  0x86   :  { %24 = vst [vmem:[#allocation5] sm:$0xff] %v23_v1 }
  0x87   :  { %76 = shalt.err (!%p73_p12)
}
  0x88   :  { %s77_s0 = scalar_lea.hbm %s129_s1, 128 }
  0x89   :  { %p78_p13 = scmp.ne.s32.totalorder %s129_s1, %s77_s0  ;;  %p81_p0 = scmp.lt.u32.totalorder %s77_s0, %s129_s1 }
  0x8b   :  { %p83_p1 = pnand %p81_p0, %p78_p13 }
  0x8d   :  { %86 = shalt.err (!%p83_p1)
}
  0x8e   :  { %34 = dma.vmem_to_hbm [thread:$0]  %s32_s20, 128, %s129_s1, [#allocation4]  }
  0x8f   :  { %89 = dma.done.wait [#allocation4], 128  }
  0x90   :  { %90 = vsyncadd [#allocation4], 4294967168 }
  0x91   :  { %38 = vsyncpa [#allocation3], 1 }
  0x92   :  { %39 = vsyncpa [#allocation4], 1 }

</bundles_post_ra>
